<compile_context>
chip_gen: v7x
topology: tpu7x:2x2x1
jax: 0.10.0
libtpu: 0.0.40
codegen_flags: <defaults>
</compile_context>

<pallas_src>
import numpy as np
import jax
import jax.numpy as jnp
from jax.experimental import pallas as pl
from jax.experimental.pallas import tpu as pltpu

# Synthetic SMPL sizes (real SMPL: V = 6890). Kept small but layout friendly.
V = 256                     # vertices (2 x 128 lanes)
NJ = 24                     # joints
NPOSE = (NJ - 1) * 9        # 207 pose-blendshape features
NBETA = 10                  # shape coefficients
NFEAT_RAW = NBETA + NPOSE   # 217
NFEAT = 224                 # padded to a multiple of 16 (bf16 sublane packing)

VMEM_LIMIT = 32 * 1024 * 1024   # explicit scoped-VMEM limit (safe on v7x too)

# SMPL kinematic tree parents
PARENTS = np.array([-1, 0, 0, 0, 1, 2, 3, 4, 5, 6, 7, 8, 9, 9, 9,
                    12, 13, 14, 16, 17, 18, 19, 20, 21], dtype=np.int32)


# -----------------------------------------------------------------------------
# Kernel 1: fused shape+pose blendshapes (single bf16 matmul, tiled over 3V).
# -----------------------------------------------------------------------------
def _blend_kernel(feat_ref, vtemplate_ref, dirs_ref, vposed_ref):
    # feat [B, NFEAT] bf16 ; vtemplate [1, TN] f32 ; dirs [NFEAT, TN] bf16
    # bf16 x bf16 feeds the MXU natively; f32 accumulate via preferred type.
    vposed_ref[...] = vtemplate_ref[...] + jnp.dot(
        feat_ref[...], dirs_ref[...], preferred_element_type=jnp.float32)


def blend_pallas(feat_bf16, v_template_flat, dirs_bf16):
    B = feat_bf16.shape[0]
    n_cols = v_template_flat.shape[1]            # 3V (multiple of 128)
    # Lane tile: largest 128-multiple <= 2048.  At the synthetic size this is
    # the whole 3V axis (grid=(1,)); at real SMPL size (3V=20670) it pipelines
    # the dirs DMA and lets v7x's two TensorCores split the "parallel" axis.
    tn = min(n_cols, 2048)
    grid_n = pl.cdiv(n_cols, tn)
    flops = 2 * B * NFEAT * n_cols
    bytes_accessed = (feat_bf16.size * 2 + v_template_flat.size * 4 +
                      dirs_bf16.size * 2 + B * n_cols * 4)
    return pl.pallas_call(
        _blend_kernel,
        grid=(grid_n,),
        in_specs=[pl.BlockSpec((B, NFEAT), lambda n: (0, 0)),
                  pl.BlockSpec((1, tn), lambda n: (0, n)),
                  pl.BlockSpec((NFEAT, tn), lambda n: (0, n))],
        out_specs=pl.BlockSpec((B, tn), lambda n: (0, n)),
        out_shape=jax.ShapeDtypeStruct((B, n_cols), jnp.float32),
        compiler_params=pltpu.CompilerParams(
            dimension_semantics=("parallel",),
            vmem_limit_bytes=VMEM_LIMIT),
        cost_estimate=pl.CostEstimate(flops=flops, transcendentals=0,
                                      bytes_accessed=bytes_accessed),
    )(feat_bf16, v_template_flat, dirs_bf16)


# -----------------------------------------------------------------------------
# Kernel 2: LBS skinning, component-major transforms, scale/transl folded in.
# -----------------------------------------------------------------------------
def _skin_kernel(st_ref, aT_ref, wT_ref, vp_ref, out_ref):
    # st [B, 4] f32 = (scale, tx, ty, tz)
    # aT [12B, NJ] bf16, component-major: row c*B + b holds A[b, :, c//4, c%4]
    # wT [NJ, V] bf16 ; vp / out [B, 3V] f32 coordinate-major (flat = c*V + v)
    B = st_ref.shape[0]
    T = jnp.dot(aT_ref[...], wT_ref[...],
                preferred_element_type=jnp.float32)          # [12B, V]

    def comp(c):                                             # [B, V] slab
        return T[c * B:(c + 1) * B, :]

    vp = vp_ref[...]
    vx = vp[:, 0 * V:1 * V]                                  # [B, V]
    vy = vp[:, 1 * V:2 * V]
    vz = vp[:, 2 * V:3 * V]
    x = comp(0) * vx + comp(1) * vy + comp(2) * vz + comp(3)
    y = comp(4) * vx + comp(5) * vy + comp(6) * vz + comp(7)
    z = comp(8) * vx + comp(9) * vy + comp(10) * vz + comp(11)

    st = st_ref[...]                                         # [B, 4]
    s = st[:, 0:1]                                           # [B, 1] broadcasts
    # verts * scale + transl  (SMPLServer post-scaling; SMPL transl is 0).
    out_ref[:, 0 * V:1 * V] = x * s + st[:, 1:2]
    out_ref[:, 1 * V:2 * V] = y * s + st[:, 2:3]
    out_ref[:, 2 * V:3 * V] = z * s + st[:, 3:4]


def skinning_pallas(scale_transl, aT_bf16, lbs_weights_T, v_posed_flat):
    B = v_posed_flat.shape[0]
    flops = 2 * (12 * B) * NJ * V + 8 * B * 3 * V
    bytes_accessed = (scale_transl.size * 4 + aT_bf16.size * 2 +
                      lbs_weights_T.size * 2 + v_posed_flat.size * 4 +
                      B * 3 * V * 4)
    # TODO(synk): at real SMPL size (V=6890) tile the V axis here too
    # (grid over lane blocks of wT / vp / out, "parallel" semantics).
    return pl.pallas_call(
        _skin_kernel,
        grid=(1,),
        in_specs=[pl.BlockSpec((B, 4), lambda i: (0, 0)),
                  pl.BlockSpec((12 * B, NJ), lambda i: (0, 0)),
                  pl.BlockSpec((NJ, V), lambda i: (0, 0)),
                  pl.BlockSpec((B, 3 * V), lambda i: (0, 0))],
        out_specs=pl.BlockSpec((B, 3 * V), lambda i: (0, 0)),
        out_shape=jax.ShapeDtypeStruct((B, 3 * V), jnp.float32),
        compiler_params=pltpu.CompilerParams(
            dimension_semantics=("arbitrary",),
            vmem_limit_bytes=VMEM_LIMIT),
        cost_estimate=pl.CostEstimate(flops=flops, transcendentals=0,
                                      bytes_accessed=bytes_accessed),
    )(scale_transl, aT_bf16, lbs_weights_T, v_posed_flat)


# -----------------------------------------------------------------------------
# Plain-JAX glue (tiny sequential / 24-joint pieces)
# -----------------------------------------------------------------------------
def batch_rodrigues(rot_vecs):
    # rot_vecs: [B, NJ, 3] -> [B, NJ, 3, 3]   (same formula as smplx)
    angle = jnp.linalg.norm(rot_vecs + 1e-8, axis=-1, keepdims=True)   # [B,NJ,1]
    rot_dir = rot_vecs / angle
    cos = jnp.cos(angle)[..., None]
    sin = jnp.sin(angle)[..., None]
    rx, ry, rz = rot_dir[..., 0], rot_dir[..., 1], rot_dir[..., 2]
    zeros = jnp.zeros_like(rx)
    K = jnp.stack([zeros, -rz, ry, rz, zeros, -rx, -ry, rx, zeros], axis=-1)
    K = K.reshape(rot_vecs.shape[:-1] + (3, 3))
    ident = jnp.eye(3, dtype=rot_vecs.dtype)
    return ident + sin * K + (1.0 - cos) * jnp.matmul(K, K)


def batch_rigid_transform(rot_mats, joints, parents):
    # rot_mats: [B,NJ,3,3], joints (rest): [B,NJ,3]
    B = joints.shape[0]
    rel_joints = joints.at[:, 1:].add(-joints[:, parents[1:]])
    tmat = jnp.concatenate([rot_mats, rel_joints[..., None]], axis=-1)   # [B,NJ,3,4]
    bottom = jnp.broadcast_to(jnp.array([0., 0., 0., 1.], jnp.float32),
                              (B, NJ, 1, 4))
    tmat = jnp.concatenate([tmat, bottom], axis=-2)                      # [B,NJ,4,4]

    chain = [tmat[:, 0]]
    for i in range(1, NJ):
        chain.append(jnp.matmul(chain[int(parents[i])], tmat[:, i]))
    G = jnp.stack(chain, axis=1)                                         # [B,NJ,4,4]
    posed_joints = G[..., :3, 3]

    joints_h = jnp.concatenate(
        [joints, jnp.zeros((B, NJ, 1), jnp.float32)], axis=-1)[..., None]  # [B,NJ,4,1]
    Gj = jnp.matmul(G, joints_h)                                         # [B,NJ,4,1]
    A = G - jnp.concatenate([jnp.zeros((B, NJ, 4, 3), jnp.float32), Gj], axis=-1)
    return posed_joints, A


# -----------------------------------------------------------------------------
# SMPLServer (JAX/Pallas)
# -----------------------------------------------------------------------------
class SMPLServerJax:
    def __init__(self, gender='male', betas=None, seed=42):
        # Deterministic synthetic SMPL template parameters (no .pkl/.pt load).
        key = jax.random.PRNGKey(seed)
        k_vt, k_sd, k_pd, k_jr, k_w = jax.random.split(key, 5)

        # Coordinate-major ("c-major") flattening: flat index = c*V + v.
        v_template_cmajor = 0.1 * jax.random.normal(k_vt, (3, V), dtype=jnp.float32)
        self.v_template = v_template_cmajor.T                        # [V, 3]
        self.v_template_flat = v_template_cmajor.reshape(1, 3 * V)   # [1, 3V] f32

        shapedirs_c = 0.01 * jax.random.normal(k_sd, (NBETA, 3, V), dtype=jnp.float32)
        posedirs_c = 0.001 * jax.random.normal(k_pd, (NPOSE, 3, V), dtype=jnp.float32)

        # Fused blendshape weights [NFEAT, 3V] bf16 (betas | pose_feat | pad).
        # TODO(synk): on v7x only, these could be stored fp8 (e4m3) for another
        # 2x DMA saving, pending a tolerance check against the f32 reference.
        dirs = jnp.concatenate(
            [shapedirs_c.reshape(NBETA, 3 * V),
             posedirs_c.reshape(NPOSE, 3 * V),
             jnp.zeros((NFEAT - NFEAT_RAW, 3 * V), jnp.float32)], axis=0)
        self.dirs_bf16 = dirs.astype(jnp.bfloat16)                   # [NFEAT, 3V]

        jr = jax.random.uniform(k_jr, (NJ, V), dtype=jnp.float32)
        self.j_regressor = jr / jnp.sum(jr, axis=1, keepdims=True)   # [NJ, V] f32
        # Precomputed joint-regression factors so rest joints are a tiny
        # [B,10]@[10,72] in plain XLA: joints = J_template + betas @ SJ.
        self.J_template = jnp.einsum('jv,cv->jc', self.j_regressor,
                                     v_template_cmajor).reshape(1, NJ * 3)
        self.SJ = jnp.einsum('kcv,jv->kjc', shapedirs_c,
                             self.j_regressor).reshape(NBETA, NJ * 3)

        self.lbs_weights = jax.nn.softmax(
            2.0 * jax.random.normal(k_w, (V, NJ), dtype=jnp.float32), axis=-1)
        self.lbs_weights_T = self.lbs_weights.T.astype(jnp.bfloat16)  # [NJ, V]

        self.bone_parents = PARENTS.copy().astype(int)
        self.bone_parents[0] = -1
        self.bone_ids = [[int(self.bone_parents[i]), i] for i in range(NJ)]

        param_canonical = np.zeros((1, 86), dtype=np.float32)
        param_canonical[0, 0] = 1.0
        param_canonical[0, 9] = np.pi / 6
        param_canonical[0, 12] = -np.pi / 6
        if betas is not None:
            param_canonical[0, -10:] = np.asarray(betas, dtype=np.float32)
        self.param_canonical = jnp.asarray(param_canonical)

        smpl_output = self.forward(self.param_canonical, absolute=True)
        self.verts_c = smpl_output['smpl_verts']
        self.joints_c = smpl_output['smpl_jnts']
        self.tfs_c = smpl_output['smpl_tfs']
        self.tfs_c_inv = jnp.linalg.inv(self.tfs_c[0])
        self.weights_c = smpl_output['smpl_weights']

        # Faithful to the reference: the "deshaped" params are built but the
        # original param_canonical is (re)used for the deshaped forward call;
        # since the arguments are identical we reuse the first result instead
        # of tracing/running the kernels a second time.
        param_canonical_deshaped = np.array(param_canonical)
        param_canonical_deshaped[0, -10:] = 0
        self.param_canonical_deshaped = jnp.asarray(param_canonical_deshaped)
        smpl_output_deshaped = smpl_output
        self.verts_c_deshaped = smpl_output_deshaped['smpl_verts']
        self.joints_c_deshaped = smpl_output_deshaped['smpl_jnts']
        self.tfs_c_deshaped = smpl_output_deshaped['smpl_tfs']

    def _smpl_forward(self, betas, thetas, scale, transl):
        B = betas.shape[0]
        rot_vecs = thetas.reshape(B, NJ, 3)
        rot_mats = batch_rodrigues(rot_vecs)                           # [B,NJ,3,3]
        ident = jnp.eye(3, dtype=jnp.float32)
        pose_feat = (rot_mats[:, 1:] - ident).reshape(B, NPOSE)

        # Fused blend features, cast to bf16 (the weights stay bf16 -> native MXU).
        feat = jnp.concatenate(
            [betas, pose_feat,
             jnp.zeros((B, NFEAT - NFEAT_RAW), jnp.float32)],
            axis=1).astype(jnp.bfloat16)                               # [B, NFEAT]

        # Kernel 1: single fused blendshape matmul (lane-dense [B, 3V]).
        v_posed_flat = blend_pallas(feat, self.v_template_flat, self.dirs_bf16)

        # Rest joints: tiny, stays f32 in plain XLA.
        joints_rest = (self.J_template + betas @ self.SJ).reshape(B, NJ, 3)

        posed_joints, A = batch_rigid_transform(rot_mats, joints_rest, PARENTS)

        # Component-major transposed transforms (only the 3x4 rows that matter):
        #   aT[c*B + b, j] = A[b, j, c//4, c%4],  c in 0..11
        A_T = jnp.transpose(A[:, :, :3, :].reshape(B, NJ, 12),
                            (2, 0, 1)).reshape(12 * B, NJ).astype(jnp.bfloat16)

        # Fold SMPLServer's (verts * scale + transl) into the skinning kernel;
        # SMPL itself is called with transl*0, so values match the reference.
        st = jnp.concatenate([scale, transl], axis=-1)                 # [B, 4]
        verts_flat = skinning_pallas(st, A_T, self.lbs_weights_T, v_posed_flat)
        verts = verts_flat.reshape(B, 3, V).transpose(0, 2, 1)         # [B, V, 3]

        joints = posed_joints * scale[:, :, None] + transl[:, None, :]
        weights = jnp.broadcast_to(self.lbs_weights[None], (B, V, NJ))
        return {'vertices': verts, 'joints': joints, 'T': A, 'weights': weights}

    def forward(self, smpl_params, displacement=None, v_template=None,
                absolute=False):
        # smpl_params [B, 86]: [0-scale, 1:4-trans, 4:76-thetas, 76:86-betas]
        # TODO(synk): per-vertex `displacement` and custom `v_template` paths are
        # not supported in this synthetic kernel.
        scale = smpl_params[:, 0:1]
        transl = smpl_params[:, 1:4]
        thetas = smpl_params[:, 4:76]
        betas = smpl_params[:, 76:86]

        smpl_out = self._smpl_forward(betas, thetas, scale, transl)

        output = {}
        tf_mats = smpl_out['T']
        tf_mats = tf_mats.at[:, :, :3, :].multiply(scale[:, :, None, None])
        tf_mats = tf_mats.at[:, :, :3, 3].add(transl[:, None, :])

        if not absolute:
            B = smpl_params.shape[0]
            param_canonical = jnp.broadcast_to(self.param_canonical, (B, 86))
            param_canonical = param_canonical.at[:, -10:].set(smpl_params[:, -10:])
            output_cano = self.forward(param_canonical, v_template=v_template,
                                       absolute=True)
            output_cano = {k + '_cano': v for k, v in output_cano.items()}
            output.update(output_cano)
            tfs_c_inv = jnp.linalg.inv(output_cano['smpl_tfs_cano'])
            tf_mats = jnp.einsum('bnij,bnjk->bnik', tf_mats, tfs_c_inv)

        output.update({'smpl_verts': smpl_out['vertices'].astype(jnp.float32),
                       'smpl_tfs': tf_mats,
                       'smpl_weights': smpl_out['weights'].astype(jnp.float32),
                       'smpl_jnts': smpl_out['joints'].astype(jnp.float32)})
        return output


# -----------------------------------------------------------------------------
if __name__ == "__main__":
    B = 2
    server = SMPLServerJax(betas=None)

    key = jax.random.PRNGKey(0)
    k_t, k_th, k_b = jax.random.split(key, 3)
    smpl_params = jnp.concatenate([
        jnp.ones((B, 1), jnp.float32),                        # scale
        0.1 * jax.random.normal(k_t, (B, 3), jnp.float32),    # translation
        0.2 * jax.random.normal(k_th, (B, 72), jnp.float32),  # pose (axis-angle)
        0.5 * jax.random.normal(k_b, (B, 10), jnp.float32),   # betas
    ], axis=1)

    out = server.forward(smpl_params, absolute=False)
    jax.block_until_ready(out['smpl_verts'])
    jax.block_until_ready(out['smpl_tfs'])
    jax.block_until_ready(out['smpl_jnts'])
    jax.block_until_ready(out['smpl_weights'])

    assert out['smpl_verts'].shape == (B, V, 3)
    assert out['smpl_tfs'].shape == (B, NJ, 4, 4)
    assert out['smpl_weights'].shape == (B, V, NJ)
    assert out['smpl_jnts'].shape == (B, NJ, 3)
    assert 'smpl_tfs_cano' in out
    assert bool(jnp.all(jnp.isfinite(out['smpl_verts'])))

    print("KERNEL_OK")
</pallas_src>

<mosaic_0001>
module attributes {stable_mosaic.version = 11 : i64} {
  func.func @_blend_kernel(%arg0: i32, %arg1: memref<1x224xbf16, #tpu.memory_space<vmem>>, %arg2: memref<1x768xf32, #tpu.memory_space<vmem>>, %arg3: memref<224x768xbf16, #tpu.memory_space<vmem>>, %arg4: memref<1x768xf32, #tpu.memory_space<vmem>>) attributes {dimension_semantics = [#tpu.dimension_semantics<parallel>], iteration_bounds = array<i64: 1>, scalar_prefetch = 0 : i64, scratch_operands = 0 : i64, tpu.core_type = #tpu.core_type<tc>, window_params = [{pipeline_mode = #tpu.pipeline_mode<synchronous>, transform_indices = @transform_0, window_bounds = array<i64: 1, 224>}, {transform_indices = @transform_1, window_bounds = array<i64: 1, 768>}, {transform_indices = @transform_2, window_bounds = array<i64: 224, 768>}, {transform_indices = @transform_3, window_bounds = array<i64: 1, 768>}]} {
    %c0 = arith.constant 0 : index
    %c0_0 = arith.constant 0 : index
    %0 = vector.load %arg2[%c0, %c0_0] : memref<1x768xf32, #tpu.memory_space<vmem>>, vector<1x768xf32>
    %c0_1 = arith.constant 0 : index
    %c0_2 = arith.constant 0 : index
    %1 = vector.load %arg1[%c0_1, %c0_2] : memref<1x224xbf16, #tpu.memory_space<vmem>>, vector<1x224xbf16>
    %c0_3 = arith.constant 0 : index
    %c0_4 = arith.constant 0 : index
    %2 = vector.load %arg3[%c0_3, %c0_4] : memref<224x768xbf16, #tpu.memory_space<vmem>>, vector<224x768xbf16>
    %cst = arith.constant dense<0.000000e+00> : vector<1x768xf32>
    %3 = tpu.matmul %1, %2, %cst {dimension_numbers = #tpu.dot_dimension_numbers<[1], [0], [0], [1], [0, 0, 1, 1], [], []>} : vector<1x224xbf16>, vector<224x768xbf16>, vector<1x768xf32> -> vector<1x768xf32>
    %4 = arith.addf %0, %3 : vector<1x768xf32>
    %c0_5 = arith.constant 0 : index
    %c0_6 = arith.constant 0 : index
    %5 = vector.load %arg4[%c0_5, %c0_6] : memref<1x768xf32, #tpu.memory_space<vmem>>, vector<1x768xf32>
    tpu.vector_store %arg4[%c0_5, %c0_6], %4 {strides = array<i32>} : memref<1x768xf32, #tpu.memory_space<vmem>>, vector<1x768xf32>,
    return
  }
  func.func @transform_0(%arg0: i32) -> (i32, i32) {
    %c0_i32 = arith.constant 0 : i32
    %c0_i32_0 = arith.constant 0 : i32
    %c0_i32_1 = arith.constant 0 : i32
    return %c0_i32, %c0_i32_0 : i32, i32
  }
  func.func @transform_1(%arg0: i32) -> (i32, i32) {
    %c0_i32 = arith.constant 0 : i32
    %c0_i32_0 = arith.constant 0 : i32
    return %c0_i32, %arg0 : i32, i32
  }
  func.func @transform_2(%arg0: i32) -> (i32, i32) {
    %c0_i32 = arith.constant 0 : i32
    %c0_i32_0 = arith.constant 0 : i32
    return %c0_i32, %arg0 : i32, i32
  }
  func.func @transform_3(%arg0: i32) -> (i32, i32) {
    %c0_i32 = arith.constant 0 : i32
    %c0_i32_0 = arith.constant 0 : i32
    return %c0_i32, %arg0 : i32, i32
  }
}

</mosaic_0001>

<bundles_post_ra>
// kernel: tpu_custom_call.1
= control target key start
LH: loop header
LB: loop body
LE: loop exit
PB: predicated region body
PF: predicated region fallthrough
CT: control target
= control target key end

     0   :  { %8 = vsyncpa [#allocation3], 0  ;;  %s1183_s0 = inlined_call_operand.hbm [shape: bf16[1,224], index: 0, kind: input, shape index: {}]   ;;  %s1184_s1 = inlined_call_operand.hbm [shape: f32[1,768], index: 1, kind: input, shape index: {}]   ;;  %s1185_s2 = inlined_call_operand.hbm [shape: bf16[224,768], index: 2, kind: input, shape index: {}]   ;;  %s1186_s3 = inlined_call_operand.hbm [shape: f32[1,768], index: 3, kind: output, shape index: {}]  }
   0x1   :  { %9 = vsyncpa [#allocation6], 0 }
   0x2   :  { %10 = vsyncpa [#allocation4], 0  ;;  %s1094_s12 = smov [#allocation5]   ;;  %s1095_s14 = smov [#allocation2]  }
   0x3   :  { %s27_s13 = sshll.u32 %s1094_s12, 4  ;;  %s17_s15 = sshll.u32 %s1095_s14, 4  ;;  %s28_s13 = int_to_ptr.vmem [resolvable:$true] %s27_s13  ;;  %s18_s15 = int_to_ptr.vmem [resolvable:$true] %s17_s15 }
   0x4   :  { %s1000_s18 = scalar_lea.hbm %s1184_s1, 96 }
   0x5   :  { %p1001_p0 = scmp.ne.s32.totalorder %s1184_s1, %s1000_s18  ;;  %p1004_p1 = scmp.lt.u32.totalorder %s1000_s18, %s1184_s1 }
   0x7   :  { %p1006_p2 = pnand %p1004_p1, %p1001_p0 }
   0x9   :  { %1009 = shalt.err (!%p1006_p2)
}
   0xa   :  { %s1010_s23 = scalar_lea.vmem %s28_s13, 96  ;;  %p1015_p4 = scmp.lt.s32.totalorder %s28_s13, %s28_s13 }
   0xb   :  { %p1011_p3 = scmp.ne.s32.totalorder %s28_s13, %s1010_s23  ;;  %p1016_p5 = scmp.lt.s32.totalorder %s1010_s23, %s1010_s23 }
   0xd   :  { %p1017_p6 = por %p1016_p5, %p1015_p4 }
   0xf   :  { %p1018_p7 = pnand %p1017_p6, %p1011_p3 }
  0x11   :  { %1021 = shalt.err (!%p1018_p7)
}
  0x12   :  { %30 = dma.hbm_to_vmem [thread:$0]  %s1184_s1, 96, %s28_s13, [#allocation6]  }
  0x13   :  { %s1022_s28 = scalar_lea.hbm %s1183_s0, 32 }
  0x14   :  { %p1023_p8 = scmp.ne.s32.totalorder %s1183_s0, %s1022_s28  ;;  %p1026_p9 = scmp.lt.u32.totalorder %s1022_s28, %s1183_s0 }
  0x16   :  { %p1028_p10 = pnand %p1026_p9, %p1023_p8 }
  0x18   :  { %1031 = shalt.err (!%p1028_p10)
}
  0x19   :  { %s1032_s6 = scalar_lea.vmem %s18_s15, 32  ;;  %p1037_p12 = scmp.lt.s32.totalorder %s18_s15, %s18_s15 }
  0x1a   :  { %p1033_p11 = scmp.ne.s32.totalorder %s18_s15, %s1032_s6  ;;  %p1038_p13 = scmp.lt.s32.totalorder %s1032_s6, %s1032_s6 }
  0x1c   :  { %p1039_p0 = por %p1038_p13, %p1037_p12 }
  0x1e   :  { %p1040_p1 = pnand %p1039_p0, %p1033_p11 }
  0x20   :  { %1043 = shalt.err (!%p1040_p1)
}
  0x21   :  { %20 = dma.hbm_to_vmem [thread:$0]  %s1183_s0, 32, %s18_s15, [#allocation3]  }
  0x22   :  { %s1096_s8 = smov [#allocation7]   ;;  %s1044_s12 = scalar_lea.hbm %s1185_s2, 10752 }
  0x23   :  { %s36_s9 = sshll.u32 %s1096_s8, 4  ;;  %p1045_p2 = scmp.ne.s32.totalorder %s1185_s2, %s1044_s12  ;;  %s37_s9 = int_to_ptr.vmem [resolvable:$true] %s36_s9 }
  0x24   :  { %p1048_p3 = scmp.lt.u32.totalorder %s1044_s12, %s1185_s2 }
  0x26   :  { %p1050_p4 = pnand %p1048_p3, %p1045_p2 }
  0x28   :  { %1053 = shalt.err (!%p1050_p4)
}
  0x29   :  { %s1054_s18 = scalar_lea.vmem %s37_s9, 10752  ;;  %p1059_p6 = scmp.lt.s32.totalorder %s37_s9, %s37_s9 }
  0x2a   :  { %p1055_p5 = scmp.ne.s32.totalorder %s37_s9, %s1054_s18  ;;  %p1060_p7 = scmp.lt.s32.totalorder %s1054_s18, %s1054_s18 }
  0x2c   :  { %p1061_p8 = por %p1060_p7, %p1059_p6 }
  0x2e   :  { %p1062_p9 = pnand %p1061_p8, %p1055_p5 }
  0x30   :  { %1065 = shalt.err (!%p1062_p9)
}
  0x31   :  { %s1097_s0 = smov 384   ;;  %s1098_s15 = smov 24  }
  0x32   :  { %42 = dma.hbm_to_vmem [thread:$0]  %s1185_s2, 10752, %s37_s9, [#allocation6], %s1097_s0, %s1097_s0, %s1098_s15  }
  0x33   :  { %1088 = dma.done.wait [#allocation3], 32  }
  0x34   :  { %1089 = vsyncadd [#allocation3], 4294967264 }
  0x35   :  { %1090 = dma.done.wait [#allocation6], 10848  }
  0x36   :  { %1091 = vsyncadd [#allocation6], 4294956448  ;;  %v874_v0 = vld [vmem:[#allocation7 + $0x4] ss:$24 sps:$4 sm:$0xff]   ;;  %v878_v2 = vld [vmem:[#allocation7] ss:$24 sps:$4 sm:$0xff]   ;;  %v151_v35 = vlaneseq }
  0x37   :  { %v876_v1 = vld [vmem:[#allocation7 + $0xc] ss:$24 sps:$4 sm:$0xff]   ;;  %587 = vmatprep.subr.bf16.mxu0 %v874_v0  ;;  %v879_v3 = vld [vmem:[#allocation7 + $0x8] ss:$24 sps:$4 sm:$0xff]   ;;  %v882_v5 = vld [vmem:[#allocation7 + $0x3c] ss:$24 sps:$4 sm:$0xff]  }
  0x38   :  { %628 = vmatprep.subr.bf16.mxu1 %v876_v1  ;;  %v880_v4 = vld [vmem:[#allocation7 + $0x34] ss:$24 sps:$4 sm:$0xff]   ;;  %588 = vmatpush1.bf16.msra.mxu0 %v878_v2  ;;  %v884_v6 = vld [vmem:[#allocation7 + $0x30] ss:$24 sps:$4 sm:$0xff]   ;;  %v886_v8 = vld [vmem:[#allocation7 + $0x64] ss:$24 sps:$4 sm:$0xff]  }
  0x39   :  { %629 = vmatpush1.bf16.msra.mxu1 %v879_v3  ;;  %589 = vmatprep.subr.bf16.mxu0 %v880_v4  ;;  %v885_v7 = vld [vmem:[#allocation7 + $0x38] ss:$24 sps:$4 sm:$0xff]   ;;  %v888_v9 = vld [vmem:[#allocation7 + $0x6c] ss:$24 sps:$4 sm:$0xff]   ;;  %v891_v11 = vld [vmem:[#allocation7 + $0x68] ss:$24 sps:$4 sm:$0xff]  }
  0x3a   :  { %630 = vmatprep.subr.bf16.mxu1 %v882_v5  ;;  %v890_v10 = vld [vmem:[#allocation7 + $0x60] ss:$24 sps:$4 sm:$0xff]   ;;  %v892_v12 = vld [vmem:[#allocation7 + $0x94] ss:$24 sps:$4 sm:$0xff]   ;;  %v896_v14 = vld [vmem:[#allocation7 + $0x90] ss:$24 sps:$4 sm:$0xff]  }
  0x3b   :  { %v894_v13 = vld [vmem:[#allocation7 + $0x9c] ss:$24 sps:$4 sm:$0xff]   ;;  %v897_v15 = vld [vmem:[#allocation7 + $0x98] ss:$24 sps:$4 sm:$0xff]   ;;  %v900_v17 = vld [vmem:[#allocation7 + $0xcc] ss:$24 sps:$4 sm:$0xff]  }
  0x3c   :  { %590 = vmatpush1.bf16.msra.mxu0 %v884_v6  ;;  %v898_v16 = vld [vmem:[#allocation7 + $0xc4] ss:$24 sps:$4 sm:$0xff]   ;;  %v902_v18 = vld [vmem:[#allocation7 + $0xc0] ss:$24 sps:$4 sm:$0xff]   ;;  %v904_v20 = vld [vmem:[#allocation7 + $0xf4] ss:$24 sps:$4 sm:$0xff]  }
  0x3d   :  { %631 = vmatpush1.bf16.msra.mxu1 %v885_v7  ;;  %591 = vmatprep.subr.bf16.mxu0 %v886_v8  ;;  %v903_v19 = vld [vmem:[#allocation7 + $0xc8] ss:$24 sps:$4 sm:$0xff]   ;;  %v906_v21 = vld [vmem:[#allocation7 + $0xfc] ss:$24 sps:$4 sm:$0xff]   ;;  %v909_v23 = vld [vmem:[#allocation7 + $0xf8] ss:$24 sps:$4 sm:$0xff]  }
  0x3e   :  { %632 = vmatprep.subr.bf16.mxu1 %v888_v9  ;;  %v908_v22 = vld [vmem:[#allocation7 + $0xf0] ss:$24 sps:$4 sm:$0xff]   ;;  %v910_v24 = vld [vmem:[#allocation7 + $0x124] ss:$24 sps:$4 sm:$0xff]   ;;  %v914_v26 = vld [vmem:[#allocation7 + $0x120] ss:$24 sps:$4 sm:$0xff]  }
  0x3f   :  { %v912_v25 = vld [vmem:[#allocation7 + $0x12c] ss:$24 sps:$4 sm:$0xff]   ;;  %v915_v27 = vld [vmem:[#allocation7 + $0x128] ss:$24 sps:$4 sm:$0xff]   ;;  %v918_v29 = vld [vmem:[#allocation7 + $0x15c] ss:$24 sps:$4 sm:$0xff]  }
  0x40   :  { %592 = vmatpush1.bf16.msra.mxu0 %v890_v10  ;;  %v916_v28 = vld [vmem:[#allocation7 + $0x154] ss:$24 sps:$4 sm:$0xff]   ;;  %v920_v30 = vld [vmem:[#allocation7 + $0x150] ss:$24 sps:$4 sm:$0xff]   ;;  %v922_v32 = vld [vmem:[#allocation7 + $0x184] ss:$24 sps:$4 sm:$0xff]  }
  0x41   :  { %633 = vmatpush1.bf16.msra.mxu1 %v891_v11  ;;  %593 = vmatprep.subr.bf16.mxu0 %v892_v12  ;;  %v921_v31 = vld [vmem:[#allocation7 + $0x158] ss:$24 sps:$4 sm:$0xff]   ;;  %v1099_v33 = vmov 1966171168   ;;  %v924_v36 = vld [vmem:[#allocation7 + $0x18c] ss:$24 sps:$4 sm:$0xff]  }
  0x42   :  { %634 = vmatprep.subr.bf16.mxu1 %v894_v13  ;;  %v149_v34 = vunpack.c.l.s4 %v1099_v33  ;;  %v926_v37 = vld [vmem:[#allocation7 + $0x180] ss:$24 sps:$4 sm:$0xff]   ;;  %v928_v39 = vld [vmem:[#allocation7 + $0x1b4] ss:$24 sps:$4 sm:$0xff]   ;;  %v152_v41 = vshrl.u32 %v151_v35, 7  ;;  %vm583_vm0 = vcmask 785408  }
  0x43   :  { %v927_v38 = vld [vmem:[#allocation7 + $0x188] ss:$24 sps:$4 sm:$0xff]   ;;  %v930_v42 = vld [vmem:[#allocation7 + $0x1bc] ss:$24 sps:$4 sm:$0xff]   ;;  %v933_v44 = vld [vmem:[#allocation7 + $0x1b8] ss:$24 sps:$4 sm:$0xff]  }
  0x44   :  { %594 = vmatpush1.bf16.msra.mxu0 %v896_v14  ;;  %v150_v40 = vunpack.c.0.s8 %v149_v34  ;;  %v932_v43 = vld [vmem:[#allocation7 + $0x1b0] ss:$24 sps:$4 sm:$0xff]   ;;  %v934_v45 = vld [vmem:[#allocation7 + $0x1e4] ss:$24 sps:$4 sm:$0xff]   ;;  %v938_v50 = vld [vmem:[#allocation7 + $0x1e0] ss:$24 sps:$4 sm:$0xff]  }
  0x45   :  { %635 = vmatpush1.bf16.msra.mxu1 %v897_v15  ;;  %595 = vmatprep.subr.bf16.mxu0 %v898_v16  ;;  %v936_v47 = vld [vmem:[#allocation7 + $0x1ec] ss:$24 sps:$4 sm:$0xff]   ;;  %v779_v48 = vld.sshfl [vmem:[#allocation2] sm:$0x11 pattern:$0x75316420] }
  0x46   :  { %636 = vmatprep.subr.bf16.mxu1 %v900_v17  ;;  %v1158_v46 = vsub.s32 %v150_v40, %v152_v41  ;;  %v147_v49 = vcombine.high %v779_v48, %v779_v48  ;;  %v939_v51 = vld [vmem:[#allocation7 + $0x1e8] ss:$24 sps:$4 sm:$0xff]   ;;  %v940_v53 = vld [vmem:[#allocation7 + $0x214] ss:$24 sps:$4 sm:$0xff]   ;;  %v945_v56 = vld [vmem:[#allocation7 + $0x218] ss:$24 sps:$4 sm:$0xff]  }
  0x47   :  { %v942_v54 = vld [vmem:[#allocation7 + $0x21c] ss:$24 sps:$4 sm:$0xff]   ;;  %v944_v55 = vld [vmem:[#allocation7 + $0x210] ss:$24 sps:$4 sm:$0xff]   ;;  %v948_v58 = vld [vmem:[#allocation7 + $0x24c] ss:$24 sps:$4 sm:$0xff]  }
  0x48   :  { %596 = vmatpush1.bf16.msra.mxu0 %v902_v18  ;;  %v161_v52 = vrot.slane %v147_v49, %v1158_v46  ;;  %v946_v57 = vld [vmem:[#allocation7 + $0x244] ss:$24 sps:$4 sm:$0xff]   ;;  %v950_v59 = vld [vmem:[#allocation7 + $0x240] ss:$24 sps:$4 sm:$0xff]   ;;  %v952_v61 = vld [vmem:[#allocation7 + $0x274] ss:$24 sps:$4 sm:$0xff]   ;;  %v154_v2 = vrot.slane %v779_v48, %v1158_v46 }
  0x49   :  { %637 = vmatpush1.bf16.msra.mxu1 %v903_v19  ;;  %597 = vmatprep.subr.bf16.mxu0 %v904_v20  ;;  %v951_v60 = vld [vmem:[#allocation7 + $0x248] ss:$24 sps:$4 sm:$0xff]   ;;  %v954_v62 = vld [vmem:[#allocation7 + $0x27c] ss:$24 sps:$4 sm:$0xff]   ;;  %v957_v0 = vld [vmem:[#allocation7 + $0x278] ss:$24 sps:$4 sm:$0xff]  }
  0x4a   :  { %638 = vmatprep.subr.bf16.mxu1 %v906_v21  ;;  %864 = vmatprep.mubr.msk.bf16.mxu0 %vm583_vm0, %v161_v52  ;;  %v956_v63 = vld [vmem:[#allocation7 + $0x270] ss:$24 sps:$4 sm:$0xff]   ;;  %v960_v1 = vld [vmem:[#allocation7 + $0x14] ss:$24 sps:$4 sm:$0xff]   ;;  %v963_v4 = vld [vmem:[#allocation7 + $0x44] ss:$24 sps:$4 sm:$0xff]  }
  0x4b   :  { %865 = vmatprep.mubr.msk.bf16.mxu1 %vm583_vm0, %v161_v52  ;;  %v958_v3 = vld [vmem:[#allocation7 + $0x10] ss:$24 sps:$4 sm:$0xff]   ;;  %v961_v5 = vld [vmem:[#allocation7 + $0x40] ss:$24 sps:$4 sm:$0xff]   ;;  %v966_v6 = vld [vmem:[#allocation7 + $0x74] ss:$24 sps:$4 sm:$0xff]  }
  0x4c   :  { %598 = vmatpush1.bf16.msra.mxu0 %v908_v22  ;;  %v964_v7 = vld [vmem:[#allocation7 + $0x70] ss:$24 sps:$4 sm:$0xff]   ;;  %v969_v8 = vld [vmem:[#allocation7 + $0xa4] ss:$24 sps:$4 sm:$0xff]   ;;  %v967_v9 = vld [vmem:[#allocation7 + $0xa0] ss:$24 sps:$4 sm:$0xff]  }
  0x4d   :  { %639 = vmatpush1.bf16.msra.mxu1 %v909_v23  ;;  %599 = vmatprep.subr.bf16.mxu0 %v910_v24  ;;  %v972_v10 = vld [vmem:[#allocation7 + $0xd4] ss:$24 sps:$4 sm:$0xff]   ;;  %v970_v11 = vld [vmem:[#allocation7 + $0xd0] ss:$24 sps:$4 sm:$0xff]   ;;  %v975_v12 = vld [vmem:[#allocation7 + $0x104] ss:$24 sps:$4 sm:$0xff]  }
  0x4e   :  { %640 = vmatprep.subr.bf16.mxu1 %v912_v25  ;;  %v973_v13 = vld [vmem:[#allocation7 + $0x100] ss:$24 sps:$4 sm:$0xff]   ;;  %v978_v14 = vld [vmem:[#allocation7 + $0x134] ss:$24 sps:$4 sm:$0xff]   ;;  %v976_v15 = vld [vmem:[#allocation7 + $0x130] ss:$24 sps:$4 sm:$0xff]  }
  0x4f   :  { %v981_v16 = vld [vmem:[#allocation7 + $0x164] ss:$24 sps:$4 sm:$0xff]   ;;  %v979_v17 = vld [vmem:[#allocation7 + $0x160] ss:$24 sps:$4 sm:$0xff]   ;;  %v984_v18 = vld [vmem:[#allocation7 + $0x194] ss:$24 sps:$4 sm:$0xff]  }
  0x50   :  { %600 = vmatpush1.bf16.msra.mxu0 %v914_v26  ;;  %v982_v19 = vld [vmem:[#allocation7 + $0x190] ss:$24 sps:$4 sm:$0xff]   ;;  %v987_v20 = vld [vmem:[#allocation7 + $0x1c4] ss:$24 sps:$4 sm:$0xff]   ;;  %v985_v21 = vld [vmem:[#allocation7 + $0x1c0] ss:$24 sps:$4 sm:$0xff]  }
  0x51   :  { %641 = vmatpush1.bf16.msra.mxu1 %v915_v27  ;;  %601 = vmatprep.subr.bf16.mxu0 %v916_v28  ;;  %v990_v22 = vld [vmem:[#allocation7 + $0x1f4] ss:$24 sps:$4 sm:$0xff]   ;;  %v988_v23 = vld [vmem:[#allocation7 + $0x1f0] ss:$24 sps:$4 sm:$0xff]   ;;  %v993_v24 = vld [vmem:[#allocation7 + $0x224] ss:$24 sps:$4 sm:$0xff]  }
  0x52   :  { %642 = vmatprep.subr.bf16.mxu1 %v918_v29  ;;  %v991_v25 = vld [vmem:[#allocation7 + $0x220] ss:$24 sps:$4 sm:$0xff]   ;;  %v996_v26 = vld [vmem:[#allocation7 + $0x254] ss:$24 sps:$4 sm:$0xff]   ;;  %v994_v27 = vld [vmem:[#allocation7 + $0x250] ss:$24 sps:$4 sm:$0xff]  }
  0x53   :  { %v999_v28 = vld [vmem:[#allocation7 + $0x284] ss:$24 sps:$4 sm:$0xff]   ;;  %v997_v29 = vld [vmem:[#allocation7 + $0x280] ss:$24 sps:$4 sm:$0xff]   ;;  %s1100_s2 = smov [#allocation8]   ;;  %vm760_vm1 = vcmp.lt.s32.totalorder %v151_v35, 768 }
  0x54   :  { %602 = vmatpush1.bf16.msra.mxu0 %v920_v30  ;;  %s769_s21 = sshll.u32 %s1100_s2, 4  ;;  %s770_s21 = int_to_ptr.vmem [resolvable:$true] %s769_s21 }
  0x55   :  { %643 = vmatpush1.bf16.msra.mxu1 %v921_v31  ;;  %603 = vmatprep.subr.bf16.mxu0 %v922_v32  ;;  %s1066_s22 = scalar_lea.vmem %s770_s21, 96  ;;  %p1071_p11 = scmp.lt.s32.totalorder %s770_s21, %s770_s21 }
  0x56   :  { %644 = vmatprep.subr.bf16.mxu1 %v924_v36  ;;  %p1067_p10 = scmp.ne.s32.totalorder %s770_s21, %s1066_s22  ;;  %p1072_p12 = scmp.lt.s32.totalorder %s1066_s22, %s1066_s22 }
  0x58   :  { %604 = vmatpush1.bf16.msra.mxu0 %v926_v37  ;;  %p1073_p13 = por %p1072_p12, %p1071_p11 }
  0x59   :  { %645 = vmatpush1.bf16.msra.mxu1 %v927_v38  ;;  %605 = vmatprep.subr.bf16.mxu0 %v928_v39 }
  0x5a   :  { %646 = vmatprep.subr.bf16.mxu1 %v930_v42  ;;  %p1074_p0 = pnand %p1073_p13, %p1067_p10 }
  0x5c   :  { %606 = vmatpush1.bf16.msra.mxu0 %v932_v43 }
  0x5d   :  { %647 = vmatpush1.bf16.msra.mxu1 %v933_v44  ;;  %607 = vmatprep.subr.bf16.mxu0 %v934_v45 }
  0x5e   :  { %648 = vmatprep.subr.bf16.mxu1 %v936_v47 }
  0x60   :  { %608 = vmatpush1.bf16.msra.mxu0 %v938_v50 }
  0x61   :  { %649 = vmatpush1.bf16.msra.mxu1 %v939_v51  ;;  %609 = vmatprep.subr.bf16.mxu0 %v940_v53  ;;  %v53_v53 = vld [vmem:[#allocation5] sm:$0x3f] }
  0x62   :  { %650 = vmatprep.subr.bf16.mxu1 %v942_v54 }
  0x64   :  { %610 = vmatpush1.bf16.msra.mxu0 %v944_v55 }
  0x65   :  { %651 = vmatpush1.bf16.msra.mxu1 %v945_v56  ;;  %611 = vmatprep.subr.bf16.mxu0 %v946_v57 }
  0x66   :  { %652 = vmatprep.subr.bf16.mxu1 %v948_v58 }
  0x68   :  { %612 = vmatpush1.bf16.msra.mxu0 %v950_v59 }
  0x69   :  { %653 = vmatpush1.bf16.msra.mxu1 %v951_v60  ;;  %613 = vmatprep.subr.bf16.mxu0 %v952_v61 }
  0x6a   :  { %654 = vmatprep.subr.bf16.mxu1 %v954_v62 }
  0x6c   :  { %614 = vmatpush1.bf16.msra.mxu0 %v956_v63 }
  0x6d   :  { %655 = vmatpush1.bf16.msra.mxu1 %v957_v0  ;;  %669 = vmatprep.subr.bf16.mxu0 %v960_v1 }
  0x6f   :  { %620 = vmatmul.mubr.bf16.vlgmr.msra.gmra.mrb[0].mxu0 %v154_v2 }
  0x70   :  { %661 = vmatmul.mubr.bf16.vlgmr.msra.gmra.mrb[0].mxu1 %v154_v2  ;;  %670 = vmatpush1.bf16.msra.mxu0 %v958_v3 }
  0x71   :  { %866 = vmatprep.mubr.msk.bf16.mxu0 %vm583_vm0, %v161_v52  ;;  %671 = vmatprep.subr.bf16.mxu0 %v963_v4 }
  0x74   :  { %672 = vmatpush1.bf16.msra.mxu0 %v961_v5 }
  0x75   :  { %673 = vmatprep.subr.bf16.mxu0 %v966_v6 }
  0x78   :  { %674 = vmatpush1.bf16.msra.mxu0 %v964_v7 }
  0x79   :  { %675 = vmatprep.subr.bf16.mxu0 %v969_v8 }
  0x7c   :  { %676 = vmatpush1.bf16.msra.mxu0 %v967_v9 }
  0x7d   :  { %677 = vmatprep.subr.bf16.mxu0 %v972_v10 }
  0x80   :  { %678 = vmatpush1.bf16.msra.mxu0 %v970_v11 }
  0x81   :  { %679 = vmatprep.subr.bf16.mxu0 %v975_v12 }
  0x84   :  { %680 = vmatpush1.bf16.msra.mxu0 %v973_v13 }
  0x85   :  { %681 = vmatprep.subr.bf16.mxu0 %v978_v14 }
  0x88   :  { %682 = vmatpush1.bf16.msra.mxu0 %v976_v15 }
  0x89   :  { %683 = vmatprep.subr.bf16.mxu0 %v981_v16 }
  0x8c   :  { %684 = vmatpush1.bf16.msra.mxu0 %v979_v17 }
  0x8d   :  { %685 = vmatprep.subr.bf16.mxu0 %v984_v18 }
  0x90   :  { %686 = vmatpush1.bf16.msra.mxu0 %v982_v19 }
  0x91   :  { %687 = vmatprep.subr.bf16.mxu0 %v987_v20 }
  0x94   :  { %688 = vmatpush1.bf16.msra.mxu0 %v985_v21 }
  0x95   :  { %689 = vmatprep.subr.bf16.mxu0 %v990_v22 }
  0x98   :  { %690 = vmatpush1.bf16.msra.mxu0 %v988_v23 }
  0x99   :  { %691 = vmatprep.subr.bf16.mxu0 %v993_v24 }
  0x9c   :  { %692 = vmatpush1.bf16.msra.mxu0 %v991_v25 }
  0x9d   :  { %693 = vmatprep.subr.bf16.mxu0 %v996_v26 }
  0xa0   :  { %694 = vmatpush1.bf16.msra.mxu0 %v994_v27 }
  0xa1   :  { %695 = vmatprep.subr.bf16.mxu0 %v999_v28 }
  0xa4   :  { %696 = vmatpush1.bf16.msra.mxu0 %v997_v29 }
  0xa7   :  { %702 = vmatmul.mubr.bf16.vlgmr.msra.gmra.mrb[4].mxu0 %v154_v2 }
 0x142   :  { %v621_v30 = vpop.f32.mrb[0].mxu0 }
 0x143   :  { %v662_v31 = vpop.f32.mrb[0].mxu1  ;;  %v623_v32 = vpop.f32.mrb[1].mxu0 }
 0x144   :  { %v664_v33 = vpop.f32.mrb[1].mxu1  ;;  %v716_v34 = vcombine.low %v621_v30, %v623_v32  ;;  %v625_v37 = vpop.f32.mrb[2].mxu0 }
 0x145   :  { %v717_v36 = vcombine.low %v662_v31, %v664_v33  ;;  %v666_v38 = vpop.f32.mrb[2].mxu1  ;;  %v626_v39 = vpop.f32.mrb[3].mxu0 }
 0x146   :  { %v667_v40 = vpop.f32.mrb[3].mxu1  ;;  %v725_v41 = vrot.slane %v716_v34, %v1158_v46 }
 0x147   :  { %v732_v42 = vrot.slane %v717_v36, %v1158_v46 }
 0x149   :  { %v740_v43 = vcombine.low %v725_v41, %v732_v42 }
 0x14b   :  { %v747_v51 = vrot.slane %v740_v43, %v1158_v46 }
 0x17a   :  { %v703_v44 = vpop.f32.mrb[4].mxu0 }
 0x17b   :  { %v705_v45 = vpop.f32.mrb[5].mxu0 }
 0x17c   :  { %v718_v47 = vcombine.low %v703_v44, %v705_v45  ;;  %v707_v48 = vpop.f32.mrb[6].mxu0 }
 0x17d   :  { %v708_v49 = vpop.f32.mrb[7].mxu0 }
 0x17e   :  { %v739_v50 = vrot.slane %v718_v47, %v1158_v46 }
 0x180   :  { %v754_v52 = vrot.slane %v739_v50, %v1158_v46 }
 0x182   :  { %v755_v54 = vcombine.low %v747_v51, %v754_v52 }
 0x184   :  { %v757_v55 = vadd.f32 %v755_v54, %v53_v53 }
 0x186   :  { %762 = vst.msk [vmem:[#allocation8] sm:$0x3f] %vm760_vm1, %v757_v55 }
 0x187   :  { %1077 = shalt.err (!%p1074_p0)
}
 0x188   :  { %s1078_s25 = scalar_lea.hbm %s1186_s3, 96 }
 0x189   :  { %p1079_p1 = scmp.ne.s32.totalorder %s1186_s3, %s1078_s25  ;;  %p1082_p2 = scmp.lt.u32.totalorder %s1078_s25, %s1186_s3 }
 0x18b   :  { %p1084_p3 = pnand %p1082_p2, %p1079_p1 }
 0x18d   :  { %1087 = shalt.err (!%p1084_p3)
}
 0x18e   :  { %772 = dma.vmem_to_hbm [thread:$0]  %s770_s21, 96, %s1186_s3, [#allocation4]  }
 0x18f   :  { %1092 = dma.done.wait [#allocation4], 96  }
 0x190   :  { %1093 = vsyncadd [#allocation4], 4294967200 }
 0x191   :  { %776 = vsyncpa [#allocation3], 1 }
 0x192   :  { %777 = vsyncpa [#allocation6], 1 }
 0x193   :  { %778 = vsyncpa [#allocation4], 1 }

</bundles_post_ra>
